<compile_context>
chip_gen: v6e
topology: v6e:2x2x1
jax: 0.10.0
libtpu: 0.0.40
codegen_flags: <defaults>
</compile_context>

<pallas_src>
import jax
import jax.numpy as jnp
import numpy as np
from jax import lax
from jax.experimental import pallas as pl
from jax.experimental.pallas import tpu as pltpu

NEG_SLOPE = 0.01                      # F.leaky_relu default negative slope
_VMEM_LIMIT = 32 * 1024 * 1024        # safe on v5e/v6e/v7x; raises v5e's 16 MiB default
_FUSED_F32_BYTES = 4 * 1024 * 1024    # fused-path threshold on the f32 working set of cfts


def _round_up(x, m):
    return ((x + m - 1) // m) * m


def _leaky_relu(q):
    return jnp.where(q >= 0.0, q, NEG_SLOPE * q)


# --------------------------------------------------------------------------------------
# Fused single-call kernel (small / medium inputs: cfts resident in VMEM).
# --------------------------------------------------------------------------------------
def _fused_kernel(cft_ref, lin_ref, fc1_ref, out_ref):
    """cft_ref: (M, N, D); lin_ref/fc1_ref: (1, D); out_ref: (N, D)."""
    x = cft_ref[...].astype(jnp.float32)                        # (M, N, D)
    lin = lin_ref[...].astype(jnp.float32)                      # (1, D)
    feat = _leaky_relu(x * lin)                                 # (M, N, D)
    feat_mean = jnp.mean(feat, axis=1)                          # (M, D)
    fc1 = fc1_ref[...].astype(jnp.float32)                      # (1, D)
    scores = jnp.sum(feat_mean * fc1, axis=1, keepdims=True)    # (M, 1)
    # softmax over the metapath axis (explicit, numerically stable)
    s_max = jnp.max(scores, axis=0, keepdims=True)
    e = jnp.exp(scores - s_max)
    w = e / jnp.sum(e, axis=0, keepdims=True)                   # (M, 1)
    out = jnp.sum(w[:, :, None] * x, axis=0)                    # (N, D) in f32
    out_ref[...] = out.astype(out_ref.dtype)


# --------------------------------------------------------------------------------------
# Tiled two-pass path (large N).
# --------------------------------------------------------------------------------------
def _make_score_kernel(n_nodes, node_tile):
    needs_mask = (n_nodes % node_tile) != 0

    def _score_kernel(cft_ref, lin_ref, part_ref):
        """grid=(n_tiles,): per-tile partial sum of leaky_relu(cft * linear) over nodes.

        cft_ref : (M, TN, D) node tile (all metapaths folded into the block)
        lin_ref : (1, D)
        part_ref: (1, M, D)  this tile's partial sum (plain store -> 'parallel' axis)
        """
        n = pl.program_id(0)
        x = cft_ref[...].astype(jnp.float32)                    # (M, TN, D)
        lin = lin_ref[...].astype(jnp.float32)                  # (1, D)
        feat = _leaky_relu(x * lin)                             # (M, TN, D)
        if needs_mask:
            rows = n * node_tile + lax.broadcasted_iota(
                jnp.int32, (1, node_tile, 1), 1)
            feat = jnp.where(rows < n_nodes, feat, 0.0)         # zero the ragged tail
        part_ref[...] = jnp.sum(feat, axis=1)[None]             # (1, M, D)

    return _score_kernel


def _wsum_kernel(w_ref, cft_ref, out_ref):
    """grid=(n_tiles,): out[tile] = sum_m w[m] * cft[m, tile] (f32 accumulation).

    w_ref  : SMEM (M,) f32 softmax weights (scalar prefetch)
    cft_ref: (M, TN, D)
    out_ref: (TN, D) — single plain store; no read-modify-write
    """
    M = cft_ref.shape[0]
    acc = w_ref[0] * cft_ref[0].astype(jnp.float32)
    for m in range(1, M):
        acc = acc + w_ref[m] * cft_ref[m].astype(jnp.float32)
    out_ref[...] = acc.astype(out_ref.dtype)


# --------------------------------------------------------------------------------------
# Wrapper
# --------------------------------------------------------------------------------------
def context_metapath_agg(cfts, linear, fc1_weight, *, node_tile=None, out_dtype=None):
    """cfts: (M, N, D), linear: (1, D), fc1_weight: (1, D). Returns (N, D)."""
    M, N, D = cfts.shape
    out_dtype = cfts.dtype if out_dtype is None else out_dtype

    # ---- Fast path: everything resident in VMEM, one fused call (no second HBM read,
    # no XLA epilogue round-trip, no inter-call sync).
    if M * N * D * 4 <= _FUSED_F32_BYTES:
        return pl.pallas_call(
            _fused_kernel,
            out_shape=jax.ShapeDtypeStruct((N, D), out_dtype),
            compiler_params=pltpu.CompilerParams(vmem_limit_bytes=_VMEM_LIMIT),
        )(cfts, linear, fc1_weight)

    # ---- Tiled two-pass path. Node tile ~2048 rows so each pipelined block is a few
    # MiB (amortizes the ~0.35 us per-step cost, matters most on v7x HBM).
    if node_tile is None:
        node_tile = 2048
    node_tile = int(min(node_tile, _round_up(N, 16)))
    node_tile = max(16, _round_up(node_tile, 16))   # multiple of 16: bf16 (16,128) packing
    n_tiles = pl.cdiv(N, node_tile)

    # Phase 1: per-node-tile partial feature sums; node-tile axis is "parallel"
    # (megacore split across TensorCores on v7x). Tail rows masked in-kernel (no pad).
    partials = pl.pallas_call(
        _make_score_kernel(N, node_tile),
        out_shape=jax.ShapeDtypeStruct((n_tiles, M, D), jnp.float32),
        grid_spec=pltpu.PrefetchScalarGridSpec(
            num_scalar_prefetch=0,
            grid=(n_tiles,),
            in_specs=[
                pl.BlockSpec((M, node_tile, D), lambda n: (0, n, 0)),
                pl.BlockSpec((1, D), lambda n: (0, 0)),
            ],
            out_specs=pl.BlockSpec((1, M, D), lambda n: (n, 0, 0)),
        ),
        compiler_params=pltpu.CompilerParams(
            dimension_semantics=("parallel",),
            vmem_limit_bytes=_VMEM_LIMIT,
        ),
    )(cfts, linear)

    # Tiny (M, D) epilogue in plain JAX: reduce partials, true-N mean -> fc1 -> softmax.
    feat_mean = jnp.sum(partials, axis=0) / jnp.float32(N)              # (M, D)
    scores = jnp.sum(feat_mean * fc1_weight.astype(jnp.float32), axis=1)  # (M,)
    weights = jax.nn.softmax(scores, axis=0).astype(jnp.float32)        # (M,)

    # Phase 2: weighted sum over metapaths, node-tiled, weights via scalar prefetch.
    # Ragged last output block: Pallas only writes in-bounds rows -> no slice needed.
    out = pl.pallas_call(
        _wsum_kernel,
        out_shape=jax.ShapeDtypeStruct((N, D), out_dtype),
        grid_spec=pltpu.PrefetchScalarGridSpec(
            num_scalar_prefetch=1,                                      # weights -> SMEM
            grid=(n_tiles,),
            in_specs=[pl.BlockSpec((M, node_tile, D), lambda n, w: (0, n, 0))],
            out_specs=pl.BlockSpec((node_tile, D), lambda n, w: (n, 0)),
        ),
        compiler_params=pltpu.CompilerParams(
            dimension_semantics=("parallel",),
            vmem_limit_bytes=_VMEM_LIMIT,
        ),
    )(weights, cfts)

    return out


# --------------------------------------------------------------------------------------
# Reference + test
# --------------------------------------------------------------------------------------
def _reference(cfts, linear, fc1_weight):
    """Pure-JAX replica of the PyTorch forward (aggregation part)."""
    q = cfts * linear[None]                                    # (M, N, D)
    feat = jnp.where(q >= 0.0, q, NEG_SLOPE * q)
    feat_mean = jnp.mean(feat, axis=1)                         # (M, D)
    scores = feat_mean @ fc1_weight.T                          # (M, 1)
    scores = jax.nn.softmax(scores, axis=0)                    # softmax over metapaths
    return jnp.sum(scores[:, :, None] * cfts, axis=0)          # (N, D)


def _xavier_normal(key, shape, gain):
    fan_out, fan_in = shape
    std = gain * np.sqrt(2.0 / (fan_in + fan_out))
    return std * jax.random.normal(key, shape, dtype=jnp.float32)


if __name__ == "__main__":
    # module hyper-params (small, consistent with the forward)
    num_metapaths = 3
    hidden_dim = 32
    num_heads = 4
    D = num_heads * hidden_dim          # 128

    key = jax.random.PRNGKey(0)
    k_small, k_big, k_lin, k_fc1 = jax.random.split(key, 4)

    # deterministic parameter init mirroring nn.init.xavier_normal_(gain=1.414)
    linear = _xavier_normal(k_lin, (1, D), gain=1.414)          # self.linear
    fc1_weight = _xavier_normal(k_fc1, (1, D), gain=1.414)      # self.fc1.weight

    # 1) Small case (N=50, non-multiple of 8) -> fused single-call path.
    n_small = 50
    cfts_small = jax.random.normal(k_small, (num_metapaths, n_small, D), dtype=jnp.float32)
    out_small = jax.block_until_ready(context_metapath_agg(cfts_small, linear, fc1_weight))
    ref_small = _reference(cfts_small, linear, fc1_weight)
    np.testing.assert_allclose(np.asarray(out_small), np.asarray(ref_small),
                               rtol=1e-5, atol=1e-5)

    # 2) Larger, tile-ragged case (N=3001) -> tiled two-pass path with tail masking.
    n_big = 3001
    cfts_big = jax.random.normal(k_big, (num_metapaths, n_big, D), dtype=jnp.float32)
    out_big = jax.block_until_ready(context_metapath_agg(cfts_big, linear, fc1_weight))
    ref_big = _reference(cfts_big, linear, fc1_weight)
    np.testing.assert_allclose(np.asarray(out_big), np.asarray(ref_big),
                               rtol=1e-4, atol=1e-4)

    # 3) bf16 streaming of cfts (halves HBM bytes); compute/accumulation stays f32 in-kernel.
    cfts_bf16 = cfts_big.astype(jnp.bfloat16)
    out_bf16 = jax.block_until_ready(
        context_metapath_agg(cfts_bf16, linear, fc1_weight, out_dtype=jnp.float32))
    ref_bf16 = _reference(cfts_bf16.astype(jnp.float32), linear, fc1_weight)
    np.testing.assert_allclose(np.asarray(out_bf16), np.asarray(ref_bf16),
                               rtol=1e-4, atol=1e-4)

    print("KERNEL_OK")
</pallas_src>

<mosaic_0001>
module attributes {stable_mosaic.version = 11 : i64} {
  func.func @_fused_kernel(%arg0: memref<3x50x128xf32, #tpu.memory_space<vmem>>, %arg1: memref<1x128xf32, #tpu.memory_space<vmem>>, %arg2: memref<1x128xf32, #tpu.memory_space<vmem>>, %arg3: memref<50x128xf32, #tpu.memory_space<vmem>>) attributes {dimension_semantics = [], scalar_prefetch = 0 : i64, scratch_operands = 0 : i64, tpu.core_type = #tpu.core_type<tc>} {
    %c0 = arith.constant 0 : index
    %c0_0 = arith.constant 0 : index
    %c0_1 = arith.constant 0 : index
    %0 = vector.load %arg0[%c0, %c0_0, %c0_1] : memref<3x50x128xf32, #tpu.memory_space<vmem>>, vector<3x50x128xf32>
    %c0_2 = arith.constant 0 : index
    %c0_3 = arith.constant 0 : index
    %1 = vector.load %arg1[%c0_2, %c0_3] : memref<1x128xf32, #tpu.memory_space<vmem>>, vector<1x128xf32>
    %2 = vector.shape_cast %1 : vector<1x128xf32> to vector<1x1x128xf32>
    %3 = vector.broadcast %2 : vector<1x1x128xf32> to vector<3x50x128xf32>
    %4 = arith.mulf %0, %3 : vector<3x50x128xf32>
    %cst = arith.constant 0.000000e+00 : f32
    %5 = vector.broadcast %cst : f32 to vector<3x50x128xf32>
    %6 = arith.cmpf oge, %4, %5 : vector<3x50x128xf32>
    %cst_4 = arith.constant 0.00999999977 : f32
    %7 = vector.broadcast %cst_4 : f32 to vector<3x50x128xf32>
    %8 = arith.mulf %7, %4 : vector<3x50x128xf32>
    %9 = arith.select %6, %4, %8 : vector<3x50x128xi1>, vector<3x50x128xf32>
    %cst_5 = arith.constant dense<0.000000e+00> : vector<3x128xf32>
    %10 = vector.multi_reduction <add>, %9, %cst_5 [1] : vector<3x50x128xf32> to vector<3x128xf32>
    %cst_6 = arith.constant 5.000000e+01 : f32
    %11 = vector.broadcast %cst_6 : f32 to vector<3x128xf32>
    %12 = arith.divf %10, %11 : vector<3x128xf32>
    %c0_7 = arith.constant 0 : index
    %c0_8 = arith.constant 0 : index
    %13 = vector.load %arg2[%c0_7, %c0_8] : memref<1x128xf32, #tpu.memory_space<vmem>>, vector<1x128xf32>
    %14 = vector.broadcast %13 : vector<1x128xf32> to vector<3x128xf32>
    %15 = arith.mulf %12, %14 : vector<3x128xf32>
    %cst_9 = arith.constant dense<0.000000e+00> : vector<3xf32>
    %16 = vector.multi_reduction <add>, %15, %cst_9 [1] : vector<3x128xf32> to vector<3xf32>
    %17 = vector.shape_cast %16 : vector<3xf32> to vector<3x1xf32>
    %cst_10 = arith.constant dense<0xFF800000> : vector<1xf32>
    %18 = vector.multi_reduction <maximumf>, %17, %cst_10 [0] : vector<3x1xf32> to vector<1xf32>
    %19 = vector.shape_cast %18 : vector<1xf32> to vector<1x1xf32>
    %20 = vector.broadcast %19 : vector<1x1xf32> to vector<3x1xf32>
    %21 = arith.subf %17, %20 : vector<3x1xf32>
    %22 = math.exp %21 : vector<3x1xf32>
    %cst_11 = arith.constant dense<0.000000e+00> : vector<1xf32>
    %23 = vector.multi_reduction <add>, %22, %cst_11 [0] : vector<3x1xf32> to vector<1xf32>
    %24 = vector.shape_cast %23 : vector<1xf32> to vector<1x1xf32>
    %25 = vector.broadcast %24 : vector<1x1xf32> to vector<3x1xf32>
    %26 = arith.divf %22, %25 : vector<3x1xf32>
    %27 = vector.shape_cast %26 : vector<3x1xf32> to vector<3x1x1xf32>
    %28 = vector.broadcast %27 : vector<3x1x1xf32> to vector<3x50x128xf32>
    %29 = arith.mulf %28, %0 : vector<3x50x128xf32>
    %cst_12 = arith.constant dense<0.000000e+00> : vector<50x128xf32>
    %30 = vector.multi_reduction <add>, %29, %cst_12 [0] : vector<3x50x128xf32> to vector<50x128xf32>
    %c0_13 = arith.constant 0 : index
    %c0_14 = arith.constant 0 : index
    %31 = vector.load %arg3[%c0_13, %c0_14] : memref<50x128xf32, #tpu.memory_space<vmem>>, vector<50x128xf32>
    tpu.vector_store %arg3[%c0_13, %c0_14], %30 {strides = array<i32>} : memref<50x128xf32, #tpu.memory_space<vmem>>, vector<50x128xf32>,
    return
  }
}

</mosaic_0001>

<bundles_post_ra>
// kernel: tpu_custom_call.1
= control target key start
LH: loop header
LB: loop body
LE: loop exit
PB: predicated region body
PF: predicated region fallthrough
CT: control target
= control target key end

     0   :  { %8 = vsyncpa [#allocation3], 0  ;;  %s594_s0 = inlined_call_operand.hbm [shape: f32[3,50,128], index: 0, kind: input, shape index: {}]   ;;  %s595_s1 = inlined_call_operand.vmem [shape: f32[1,128], index: 1, kind: input, shape index: {}]   ;;  %s596_s2 = inlined_call_operand.vmem [shape: f32[1,128], index: 2, kind: input, shape index: {}]   ;;  %s597_s3 = inlined_call_operand.hbm [shape: f32[50,128], index: 3, kind: output, shape index: {}]  }
   0x1   :  { %9 = vsyncpa [#allocation4], 0  ;;  %s360_s12 = smov [#allocation2]  }
   0x2   :  { %s15_s13 = sshll.u32 %s360_s12, 4  ;;  %s16_s13 = int_to_ptr.vmem [resolvable:$true] %s15_s13 }
   0x3   :  { %s324_s14 = scalar_lea.vmem %s16_s13, 2688  ;;  %p329_p1 = scmp.lt.s32.totalorder %s16_s13, %s16_s13 }
   0x4   :  { %p325_p0 = scmp.ne.s32.totalorder %s16_s13, %s324_s14  ;;  %p330_p2 = scmp.lt.s32.totalorder %s324_s14, %s324_s14 }
   0x6   :  { %p331_p3 = por %p330_p2, %p329_p1 }
   0x8   :  { %p332_p4 = pnand %p331_p3, %p325_p0 }
   0xa   :  { %335 = shalt.err (!%p332_p4)
}
   0xb   :  { %s361_s15 = smov 128   ;;  %s362_s16 = smov 8  }
   0xc   :  { %21 = dma.hbm_to_vmem [thread:$0]  %s594_s0, 2688, %s16_s13, [#allocation3], %s361_s15, %s361_s15, %s362_s16  }
   0xd   :  { %356 = dma.done.wait [#allocation3], 2688  }
   0xe   :  { %357 = vsyncadd [#allocation3], 4294964608  ;;  %v390_v0 = vld [vmem:[#allocation2] sm:$0xff]  ;;  %v392_v1 = vld [vmem:[#allocation2 + $0x8] sm:$0xff]  ;;  %vm146_vm9 = vcmask 1041408  }
   0xf   :  { %v394_v2 = vld [vmem:[#allocation2 + $0x10] sm:$0xff]  ;;  %v396_v3 = vld [vmem:[#allocation2 + $0x18] sm:$0xff]  ;;  %v398_v4 = vld [vmem:[#allocation2 + $0x20] sm:$0xff] }
  0x10   :  { %v400_v5 = vld [vmem:[#allocation2 + $0x28] sm:$0xff]  ;;  %v402_v6 = vld [vmem:[#allocation2 + $0x30] sm:$0x3]  ;;  %v404_v7 = vld [vmem:[#allocation2 + $0x38] sm:$0xff] }
  0x11   :  { %v406_v8 = vld [vmem:[#allocation2 + $0x40] sm:$0xff]  ;;  %v408_v9 = vld [vmem:[#allocation2 + $0x48] sm:$0xff]  ;;  %v410_v10 = vld [vmem:[#allocation2 + $0x50] sm:$0xff] }
  0x12   :  { %v412_v11 = vld [vmem:[#allocation2 + $0x58] sm:$0xff]  ;;  %v306_v12 = vld [vmem:[%s595_s1] ss:$0 sm:$0xff]  ;;  %v419_v14 = vld [vmem:[#allocation2 + $0x68] sm:$0x3] }
  0x13   :  { %v417_v13 = vld [vmem:[#allocation2 + $0x60] sm:$0xff]  ;;  %v421_v15 = vld [vmem:[#allocation2 + $0x70] sm:$0xff]  ;;  %v57_v16 = vmul.f32 %v306_v12, %v390_v0  ;;  %v425_v17 = vmul.f32 %v306_v12, %v392_v1  ;;  %v427_v18 = vld [vmem:[#allocation2 + $0x78] sm:$0xff]  ;;  %v434_v21 = vmul.f32 %v306_v12, %v394_v2  ;;  %v437_v22 = vmul.f32 %v306_v12, %v396_v3 }
  0x14   :  { %v429_v19 = vld [vmem:[#allocation2 + $0x80] sm:$0xff]  ;;  %v431_v20 = vld [vmem:[#allocation2 + $0x88] sm:$0xff]  ;;  %v440_v23 = vmul.f32 %v306_v12, %v398_v4  ;;  %v443_v24 = vmul.f32 %v306_v12, %v400_v5  ;;  %v445_v25 = vld [vmem:[#allocation2 + $0x90] sm:$0xff]  ;;  %v452_v28 = vmul.f32 %v306_v12, %v402_v6  ;;  %v64_v29 = vmul.f32 %v306_v12, %v404_v7 }
  0x15   :  { %v447_v26 = vld [vmem:[#allocation2 + $0x98] sm:$0xff]  ;;  %v449_v27 = vld [vmem:[#allocation2 + $0xa0] sm:$0x3]  ;;  %v65_v30 = vmul.f32 %v306_v12, %v406_v8  ;;  %v66_v31 = vmul.f32 %v306_v12, %v408_v9  ;;  %v458_v32 = vmul.f32 %v306_v12, %v410_v10  ;;  %v461_v33 = vmul.f32 %v306_v12, %v412_v11 }
  0x16   :  { %599 = vst [vmem:[#allocation8_spill] sm:$0xff] %v449_v27  ;;  %v464_v34 = vmul.f32 %v306_v12, %v417_v13  ;;  %v71_v35 = vmul.f32 %v306_v12, %v421_v15  ;;  %v468_v36 = vmul.f32 %v306_v12, %v419_v14  ;;  %v72_v37 = vmul.f32 %v306_v12, %v427_v18 }
  0x17   :  { %v73_v38 = vmul.f32 %v306_v12, %v429_v19  ;;  %v74_v39 = vmul.f32 %v306_v12, %v431_v20  ;;  %v474_v40 = vmul.f32 %v306_v12, %v445_v25  ;;  %v477_v41 = vmul.f32 %v306_v12, %v447_v26 }
  0x18   :  { %v480_v42 = vmul.f32 %v306_v12, %v449_v27  ;;  %vm78_vm0 = vcmp.ge.f32.partialorder %v57_v16, 0.0  ;;  %vm79_vm1 = vcmp.ge.f32.partialorder %v425_v17, 0.0  ;;  %vm80_vm2 = vcmp.ge.f32.partialorder %v434_v21, 0.0 }
  0x19   :  { %vm85_vm4 = vcmp.ge.f32.partialorder %v64_v29, 0.0  ;;  %vm86_vm5 = vcmp.ge.f32.partialorder %v65_v30, 0.0  ;;  %vm87_vm6 = vcmp.ge.f32.partialorder %v66_v31, 0.0  ;;  %vm92_vm8 = vcmp.ge.f32.partialorder %v71_v35, 0.0 }
  0x1a   :  { %vm93_vm12 = vcmp.ge.f32.partialorder %v72_v37, 0.0  ;;  %vm94_vm13 = vcmp.ge.f32.partialorder %v73_v38, 0.0  ;;  %vm95_vm14 = vcmp.ge.f32.partialorder %v74_v39, 0.0  ;;  %v99_v43 = vmul.f32 0.01, %v57_v16 }
  0x1b   :  { %vm91_vm15 = vcmp.ge.f32.partialorder %v468_v36, 0.0  ;;  %vm96_vm3 = vcmp.ge.f32.partialorder %v474_v40, 0.0  ;;  %v100_v44 = vmul.f32 0.01, %v425_v17  ;;  %v106_v45 = vmul.f32 0.01, %v64_v29 }
  0x1c   :  { %v107_v46 = vmul.f32 0.01, %v65_v30  ;;  %vm83_vm7 = vcmp.ge.f32.partialorder %v443_v24, 0.0  ;;  %vm98_vm10 = vcmp.ge.f32.partialorder %v480_v42, 0.0  ;;  %v101_v47 = vmul.f32 0.01, %v434_v21 }
  0x1d   :  { %v113_v48 = vmul.f32 0.01, %v71_v35  ;;  %v114_v49 = vmul.f32 0.01, %v72_v37  ;;  %vm97_vm11 = vcmp.ge.f32.partialorder %v477_v41, 0.0  ;;  %v120_v56 = vsel %vm78_vm0, %v57_v16, %v99_v43 }
  0x1e   :  { %v102_v50 = vmul.f32 0.01, %v437_v22  ;;  %v103_v51 = vmul.f32 0.01, %v440_v23  ;;  %v108_v52 = vmul.f32 0.01, %v66_v31  ;;  %v121_v58 = vsel %vm79_vm1, %v425_v17, %v100_v44 }
  0x1f   :  { %v104_v53 = vmul.f32 0.01, %v443_v24  ;;  %v105_v54 = vmul.f32 0.01, %v452_v28  ;;  %v115_v55 = vmul.f32 0.01, %v73_v38  ;;  %v127_v59 = vsel %vm85_vm4, %v64_v29, %v106_v45 }
  0x20   :  { %v109_v57 = vmul.f32 0.01, %v458_v32  ;;  %v128_v60 = vsel %vm86_vm5, %v65_v30, %v107_v46  ;;  %v110_v61 = vmul.f32 0.01, %v461_v33  ;;  %v116_v62 = vmul.f32 0.01, %v74_v39 }
  0x21   :  { %v134_v63 = vsel %vm92_vm8, %v71_v35, %v113_v48  ;;  %v135_v12 = vsel %vm93_vm12, %v72_v37, %v114_v49  ;;  %v111_v16 = vmul.f32 0.01, %v464_v34  ;;  %v112_v43 = vmul.f32 0.01, %v468_v36 }
  0x22   :  { %v122_v27 = vsel %vm80_vm2, %v434_v21, %v101_v47  ;;  %v129_v17 = vsel %vm87_vm6, %v66_v31, %v108_v52  ;;  %v117_v29 = vmul.f32 0.01, %v474_v40  ;;  %v136_v30 = vsel %vm94_vm13, %v73_v38, %v115_v55 }
  0x23   :  { %v141_v44 = vadd.f32 %v121_v58, %v120_v56  ;;  %v155_v45 = vadd.f32 %v128_v60, %v127_v59  ;;  %v119_v35 = vmul.f32 0.01, %v480_v42  ;;  %vm600_vm0 = vcmp.ge.f32.partialorder %v437_v22, 0.0 }
  0x24   :  { %v123_v37 = vsel %vm600_vm0, %v437_v22, %v102_v50  ;;  %vm601_vm1 = vcmp.ge.f32.partialorder %v458_v32, 0.0  ;;  %v168_v48 = vadd.f32 %v135_v12, %v134_v63  ;;  %v118_v21 = vmul.f32 0.01, %v477_v41 }
  0x25   :  { %v130_v46 = vsel %vm601_vm1, %v458_v32, %v109_v57  ;;  %v137_v31 = vsel %vm95_vm14, %v74_v39, %v116_v62  ;;  %v142_v47 = vadd.f32 %v141_v44, %v122_v27  ;;  %v156_v49 = vadd.f32 %v155_v45, %v129_v17 }
  0x26   :  { %vm602_vm2 = vcmp.ge.f32.partialorder %v440_v23, 0.0  ;;  %vm603_vm4 = vcmp.ge.f32.partialorder %v452_v28, 0.0  ;;  %vm604_vm5 = vcmp.ge.f32.partialorder %v461_v33, 0.0  ;;  %v169_v32 = vadd.f32 %v168_v48, %v136_v30 }
  0x27   :  { %v124_v38 = vsel %vm602_vm2, %v440_v23, %v103_v51  ;;  %v126_v52 = vsel %vm603_vm4, %v452_v28, %v105_v54  ;;  %v131_v22 = vsel %vm604_vm5, %v461_v33, %v110_v61  ;;  %v133_v50 = vsel %vm91_vm15, %v468_v36, %v112_v43 }
  0x28   :  { %v138_v27 = vsel %vm96_vm3, %v474_v40, %v117_v29  ;;  %v143_v39 = vadd.f32 %v142_v47, %v123_v37  ;;  %v157_v55 = vadd.f32 %v156_v49, %v130_v46  ;;  %v125_v23 = vsel %vm83_vm7, %v443_v24, %v104_v53  ;;  %v307_v49 = vld [vmem:[%s596_s2] ss:$0 sm:$0xff]  ;;  %s363_s2 = smov [#allocation5]  }
  0x29   :  { %vm605_vm6 = vcmp.ge.f32.partialorder %v464_v34, 0.0  ;;  %v140_v33 = vsel %vm98_vm10, %v480_v42, %v119_v35  ;;  %v170_v51 = vadd.f32 %v169_v32, %v137_v31  ;;  %v139_v36 = vsel %vm97_vm11, %v477_v41, %v118_v21  ;;  %s294_s21 = sshll.u32 %s363_s2, 4  ;;  %s295_s21 = int_to_ptr.vmem [resolvable:$true] %s294_s21 }
  0x2a   :  { %v132_v28 = vsel %vm605_vm6, %v464_v34, %v111_v16  ;;  %v144_v40 = vadd.f32 %v143_v39, %v124_v38  ;;  %v158_v54 = vadd.f32 %v157_v55, %v131_v22  ;;  %v147_v56 = vsel %vm146_vm9, %v126_v52, 0.0  ;;  %s336_s22 = scalar_lea.vmem %s295_s21, 896  ;;  %p341_p6 = scmp.lt.s32.totalorder %s295_s21, %s295_s21 }
  0x2b   :  { %v160_v57 = vsel %vm146_vm9, %v133_v50, 0.0  ;;  %v171_v24 = vadd.f32 %v170_v51, %v138_v27  ;;  %v173_v34 = vsel %vm146_vm9, %v140_v33, 0.0  ;;  %vm199_vm3 = vcmask 1041409   ;;  %p337_p5 = scmp.ne.s32.totalorder %s295_s21, %s336_s22  ;;  %p342_p7 = scmp.lt.s32.totalorder %s336_s22, %s336_s22 }
  0x2c   :  { %v145_v53 = vadd.f32 %v144_v40, %v125_v23  ;;  %v159_v58 = vadd.f32 %v158_v54, %v132_v28  ;;  %vm202_vm7 = vcmask 1042434   ;;  %vm205_vm8 = vcmask 1042432  }
  0x2d   :  { %v172_v59 = vadd.f32 %v171_v24, %v139_v36  ;;  %p343_p8 = por %p342_p7, %p341_p6 }
  0x2e   :  { %v148_v60 = vadd.f32 %v147_v56, %v145_v53  ;;  %v161_v61 = vadd.f32 %v160_v57, %v159_v58 }
  0x2f   :  { %v174_v42 = vadd.f32 %v173_v34, %v172_v59  ;;  %p344_p9 = pnand %p343_p8, %p337_p5 }
  0x30   :  { %v149_v62 = vrot.slane %v148_v60, 4  ;;  %v162_v63 = vrot.slane %v161_v61, 4 }
  0x31   :  { %v175_v12 = vrot.slane %v174_v42, 4 }
  0x32   :  { %v150_v16 = vadd.f32 %v149_v62, %v148_v60  ;;  %v163_v41 = vadd.f32 %v162_v63, %v161_v61 }
  0x33   :  { %v176_v43 = vadd.f32 %v175_v12, %v174_v42 }
  0x34   :  { %v151_v17 = vrot.slane %v150_v16, 2  ;;  %v164_v29 = vrot.slane %v163_v41, 2 }
  0x35   :  { %v177_v30 = vrot.slane %v176_v43, 2 }
  0x36   :  { %v152_v44 = vadd.f32 %v151_v17, %v150_v16  ;;  %v165_v45 = vadd.f32 %v164_v29, %v163_v41  ;;  %v229_v41 = vlaneseq }
  0x37   :  { %v178_v35 = vadd.f32 %v177_v30, %v176_v43 }
  0x38   :  { %v153_v37 = vrot.slane %v152_v44, 1  ;;  %v166_v46 = vrot.slane %v165_v45, 1  ;;  %v230_v43 = vshrl.u32 %v229_v41, 7 }
  0x39   :  { %v179_v48 = vrot.slane %v178_v35, 1 }
  0x3a   :  { %v154_v21 = vadd.f32 %v153_v37, %v152_v44  ;;  %v167_v31 = vadd.f32 %v166_v46, %v165_v45  ;;  %v231_v17 = vsub.s32 0, %v230_v43  ;;  %v235_v29 = vsub.s32 1, %v230_v43 }
  0x3b   :  { %v180_v47 = vadd.f32 %v179_v48, %v178_v35  ;;  %v239_v44 = vsub.s32 2, %v230_v43 }
  0x3c   :  { %v182_v38 = vmul.f32 0.02, %v154_v21  ;;  %v183_v52 = vmul.f32 0.02, %v167_v31 }
  0x3d   :  { %v184_v22 = vmul.f32 0.02, %v180_v47 }
  0x3e   :  { %v192_v32 = vmul.f32 %v307_v49, %v182_v38  ;;  %v193_v50 = vmul.f32 %v307_v49, %v183_v52 }
  0x3f   :  { %v194_v27 = vmul.f32 %v307_v49, %v184_v22 }
  0x40   :  { %v198_v39 = vrot.slane %v193_v50, 7 }
  0x41   :  { %v201_v55 = vrot.slane %v194_v27, 6  ;;  %v606_v27 = vld [vmem:[#allocation8_spill] sm:$0xff] }
  0x42   :  { %v200_v23 = vsel %vm199_vm3, %v198_v39, %v192_v32 }
  0x43   :  { %v203_v28 = vsel %vm202_vm7, %v201_v55, %v200_v23 }
  0x44   :  { %v206_v33 = vsel %vm205_vm8, %v203_v28, 0.0 }
  0x45   :  { %207 = vadd.xlane.f32.xlu0 %v206_v33 }
  0xce   :  { %v208_v51 = vpop.xlane.xlu0 %207 }
  0xcf   :  { %v209_v36 = vsel %vm205_vm8, %v208_v51, -inf }
  0xd0   :  { %v210_v40 = vrot.slane %v209_v36, 4 }
  0xd2   :  { %v211_v54 = vmax.f32 %v209_v36, %v210_v40 }
  0xd4   :  { %v212_v56 = vrot.slane %v211_v54, 2 }
  0xd6   :  { %v213_v57 = vmax.f32 %v211_v54, %v212_v56 }
  0xd8   :  { %v214_v24 = vrot.slane %v213_v57, 1 }
  0xda   :  { %v215_v53 = vmax.f32 %v213_v57, %v214_v24 }
  0xdc   :  { %v216_v58 = vsub.f32 %v208_v51, %v215_v53 }
  0xde   :  { %v217_v34 = vmul.f32 1.442695, %v216_v58 }
  0xe0   :  { %312 = vpow2.f32 %v217_v34 }
  0xed   :  { %v313_v59 = vpop.eup %312 }
  0xee   :  { %v219_v60 = vsel %vm205_vm8, %v313_v59, 0.0 }
  0xef   :  { %v220_v61 = vrot.slane %v219_v60, 4 }
  0xf1   :  { %v221_v42 = vadd.f32 %v220_v61, %v219_v60 }
  0xf3   :  { %v222_v62 = vrot.slane %v221_v42, 2 }
  0xf5   :  { %v223_v63 = vadd.f32 %v222_v62, %v221_v42 }
  0xf7   :  { %v224_v12 = vrot.slane %v223_v63, 1 }
  0xf9   :  { %v225_v16 = vadd.f32 %v224_v12, %v223_v63 }
  0xfb   :  { %314 = vrcp.f32 %v225_v16 }
 0x108   :  { %v315_v30 = vpop.eup %314 }
 0x109   :  { %v227_v45 = vmul.f32 %v315_v30, %v313_v59 }
 0x10b   :  { %v232_v35 = vrot.slane %v227_v45, %v231_v17  ;;  %v236_v37 = vrot.slane %v227_v45, %v235_v29  ;;  %v240_v46 = vrot.slane %v227_v45, %v239_v44 }
 0x10d   :  { %v244_v48 = vmul.f32 %v232_v35, %v390_v0  ;;  %v245_v21 = vmul.f32 %v232_v35, %v392_v1  ;;  %v246_v31 = vmul.f32 %v232_v35, %v394_v2  ;;  %v247_v47 = vmul.f32 %v232_v35, %v396_v3 }
 0x10e   :  { %v248_v49 = vmul.f32 %v232_v35, %v398_v4  ;;  %v249_v38 = vmul.f32 %v232_v35, %v400_v5  ;;  %v250_v52 = vmul.f32 %v232_v35, %v402_v6  ;;  %v251_v22 = vmul.f32 %v236_v37, %v404_v7 }
 0x10f   :  { %v252_v32 = vmul.f32 %v236_v37, %v406_v8  ;;  %v253_v50 = vmul.f32 %v236_v37, %v408_v9  ;;  %v254_v0 = vmul.f32 %v236_v37, %v410_v10  ;;  %v255_v1 = vmul.f32 %v236_v37, %v412_v11 }
 0x110   :  { %v256_v2 = vmul.f32 %v236_v37, %v417_v13  ;;  %v257_v3 = vmul.f32 %v236_v37, %v419_v14  ;;  %v258_v4 = vmul.f32 %v240_v46, %v421_v15  ;;  %v259_v5 = vmul.f32 %v240_v46, %v427_v18 }
 0x111   :  { %v260_v6 = vmul.f32 %v240_v46, %v429_v19  ;;  %v261_v7 = vmul.f32 %v240_v46, %v431_v20  ;;  %v262_v8 = vmul.f32 %v240_v46, %v445_v25  ;;  %v263_v9 = vmul.f32 %v240_v46, %v447_v26 }
 0x112   :  { %v264_v10 = vmul.f32 %v240_v46, %v606_v27  ;;  %v265_v39 = vadd.f32 %v251_v22, %v244_v48  ;;  %v267_v11 = vadd.f32 %v252_v32, %v245_v21  ;;  %v269_v55 = vadd.f32 %v253_v50, %v246_v31 }
 0x113   :  { %v271_v13 = vadd.f32 %v254_v0, %v247_v47  ;;  %v273_v23 = vadd.f32 %v255_v1, %v248_v49  ;;  %v275_v14 = vadd.f32 %v256_v2, %v249_v38  ;;  %v277_v15 = vsel %vm146_vm9, %v250_v52, 0.0 }
 0x114   :  { %v266_v28 = vadd.f32 %v265_v39, %v258_v4  ;;  %v268_v18 = vadd.f32 %v267_v11, %v259_v5  ;;  %v270_v33 = vadd.f32 %v269_v55, %v260_v6  ;;  %v278_v19 = vsel %vm146_vm9, %v257_v3, 0.0 }
 0x115   :  { %v272_v20 = vadd.f32 %v271_v13, %v261_v7  ;;  %v274_v25 = vadd.f32 %v273_v23, %v262_v8  ;;  %v276_v26 = vadd.f32 %v275_v14, %v263_v9  ;;  %v279_v51 = vadd.f32 %v278_v19, %v277_v15 }
 0x116   :  { %v280_v36 = vsel %vm146_vm9, %v264_v10, 0.0  ;;  %282 = vst [vmem:[#allocation5] sm:$0xff] %v266_v28  ;;  %283 = vst [vmem:[#allocation5 + $0x8] sm:$0xff] %v268_v18 }
 0x117   :  { %284 = vst [vmem:[#allocation5 + $0x10] sm:$0xff] %v270_v33  ;;  %v281_v40 = vadd.f32 %v280_v36, %v279_v51  ;;  %285 = vst [vmem:[#allocation5 + $0x18] sm:$0xff] %v272_v20 }
 0x118   :  { %286 = vst [vmem:[#allocation5 + $0x20] sm:$0xff] %v274_v25  ;;  %287 = vst [vmem:[#allocation5 + $0x28] sm:$0xff] %v276_v26 }
 0x119   :  { %288 = vst [vmem:[#allocation5 + $0x30] sm:$0x3] %v281_v40 }
 0x11a   :  { %347 = shalt.err (!%p344_p9)
}
 0x11b   :  { %300 = dma.vmem_to_hbm [thread:$0]  %s295_s21, 896, %s597_s3, [#allocation4], %s361_s15, %s361_s15, %s362_s16  }
 0x11c   :  { %358 = dma.done.wait [#allocation4], 896  }
 0x11d   :  { %359 = vsyncadd [#allocation4], 4294966400 }
 0x11e   :  { %304 = vsyncpa [#allocation3], 1 }
 0x11f   :  { %305 = vsyncpa [#allocation4], 1 }

</bundles_post_ra>
